<compile_context>
chip_gen: v5e
topology: v5e:2x2
jax: 0.10.0
libtpu: 0.0.40
codegen_flags: <defaults>
</compile_context>

<pallas_src>
import jax
import jax.numpy as jnp
from jax import lax
from jax.experimental import pallas as pl
from jax.experimental.pallas import tpu as pltpu


# ---------------------------------------------------------------------------
# Kernel 1: SiLU + linear projection -> (shift | scale), tiled over out cols
# ---------------------------------------------------------------------------
def silu_linear_kernel(emb_ref, w_ref, b_ref, proj_ref):
    e = emb_ref[...].astype(jnp.float32)                    # (B, D)
    se = e * jax.nn.sigmoid(e)                              # SiLU (VPU + EUP)
    acc = jnp.dot(se, w_ref[...].astype(jnp.float32),
                  preferred_element_type=jnp.float32)       # (B, TN) on the MXU
    proj_ref[...] = acc + b_ref[...].astype(jnp.float32)


# ---------------------------------------------------------------------------
# Kernel 2: LayerNorm (elementwise_affine=False, eps=1e-6) + modulation
# ---------------------------------------------------------------------------
def ada_ln_modulate_kernel(shift_ref, scale_ref, h_ref, o_ref):
    h = h_ref[0].astype(jnp.float32)                        # (TS, D)
    inv_d = jnp.float32(1.0 / h.shape[-1])
    # Single-pass statistics: one elementwise sweep feeds both XLU reductions.
    mean = jnp.sum(h, axis=-1, keepdims=True) * inv_d       # (TS, 1)
    mean_sq = jnp.sum(h * h, axis=-1, keepdims=True) * inv_d
    var = mean_sq - mean * mean
    h_norm = (h - mean) * lax.rsqrt(var + 1e-6)             # (TS, D)
    shift = shift_ref[0]                                    # (1, D) f32
    scale = scale_ref[0]                                    # (1, D) f32
    o_ref[0] = (h_norm * (1.0 + scale) + shift).astype(o_ref.dtype)


# ---------------------------------------------------------------------------
# Tile-size helpers
# ---------------------------------------------------------------------------
def _sublane(dtype):
    return {4: 8, 2: 16, 1: 32}.get(jnp.dtype(dtype).itemsize, 8)


def _choose_seq_tile(S, D, dtype, max_tile=1024, budget_bytes=24 << 20):
    """Largest sequence tile such that 4 double-buffered (tile, D) buffers fit
    the VMEM budget, sublane-aligned, preferring an exact divisor of S."""
    item = jnp.dtype(dtype).itemsize
    sub = _sublane(dtype)
    cand = min(S, max_tile)
    while cand > sub and 4 * cand * D * item > budget_bytes:
        cand //= 2
    if cand >= S:
        return S
    cand = max(sub, (cand // sub) * sub)
    t = cand
    while t > sub and S % t != 0:
        t -= sub
    return t if S % t == 0 else cand


def _choose_proj_tile(N, K, dtype, max_tile=512, budget_bytes=16 << 20):
    """Output-column tile for the projection; keeps the (K, tile) weight block
    (double-buffered) within budget and 128-lane aligned."""
    item = jnp.dtype(dtype).itemsize
    if N <= max_tile:
        return N
    cand = max_tile
    while cand > 128 and 2 * K * cand * item > budget_bytes:
        cand //= 2
    cand = max(128, (cand // 128) * 128)
    t = cand
    while t > 128 and N % t != 0:
        t -= 128
    return t if N % t == 0 else cand


# ---------------------------------------------------------------------------
# Wrappers
# ---------------------------------------------------------------------------
def _silu_linear(emb, weight, bias):
    """SiLU(emb) @ weight + bias as a Pallas call tiled over output columns."""
    B, D = emb.shape
    N = weight.shape[1]                       # 2 * D
    TN = _choose_proj_tile(N, D, weight.dtype)
    bias2d = bias.reshape(1, N)

    w_item = jnp.dtype(weight.dtype).itemsize
    vmem_limit = int(min(48 << 20,
                         max(16 << 20,
                             2 * D * TN * w_item            # weight blocks
                             + 2 * (B * D + B * TN + TN) * 4
                             + (2 << 20))))
    cost = pl.CostEstimate(
        flops=2 * B * D * N + 4 * B * D,
        transcendentals=B * D,
        bytes_accessed=(B * D + D * N + N) * w_item + B * N * 4,
    )

    return pl.pallas_call(
        silu_linear_kernel,
        out_shape=jax.ShapeDtypeStruct((B, N), jnp.float32),
        grid_spec=pltpu.PrefetchScalarGridSpec(
            num_scalar_prefetch=0,
            grid=(pl.cdiv(N, TN),),
            in_specs=[
                pl.BlockSpec((B, D), lambda n: (0, 0)),      # emb   [B, D]
                pl.BlockSpec((D, TN), lambda n: (0, n)),     # W     [D, 2D]
                pl.BlockSpec((1, TN), lambda n: (0, n)),     # bias  [1, 2D]
            ],
            out_specs=pl.BlockSpec((B, TN), lambda n: (0, n)),
        ),
        compiler_params=pltpu.CompilerParams(
            dimension_semantics=("parallel",),
            vmem_limit_bytes=vmem_limit),
        cost_estimate=cost,
    )(emb, weight, bias2d)


def ada_layer_norm_continuous(hidden_states, emb, weight, bias):
    """hidden_states: [B, S, D], emb: [B, D], weight: [D, 2D], bias: [2D]."""
    B, S, D = hidden_states.shape
    h_item = jnp.dtype(hidden_states.dtype).itemsize

    # ---- SiLU + projection (small, MXU-shaped), then split shift/scale ----
    proj = _silu_linear(emb, weight, bias)                   # (B, 2D) f32
    shift = proj[:, :D].reshape(B, 1, D)                     # split outside the
    scale = proj[:, D:].reshape(B, 1, D)                     # LN kernel (no lane slice)

    # ---- memory-bound LN + modulation, tiled over (batch, seq) ----
    TS = _choose_seq_tile(S, D, hidden_states.dtype)
    vmem_limit = int(min(48 << 20,
                         max(16 << 20,
                             4 * TS * D * h_item             # in/out double-buffered
                             + 8 * D * 4                     # shift/scale blocks
                             + (2 << 20))))
    cost = pl.CostEstimate(
        flops=8 * B * S * D,
        transcendentals=B * S,
        bytes_accessed=2 * B * S * D * h_item + 2 * B * D * 4,
    )

    return pl.pallas_call(
        ada_ln_modulate_kernel,
        out_shape=jax.ShapeDtypeStruct((B, S, D), hidden_states.dtype),
        grid_spec=pltpu.PrefetchScalarGridSpec(
            num_scalar_prefetch=0,
            grid=(B, pl.cdiv(S, TS)),
            in_specs=[
                pl.BlockSpec((1, 1, D), lambda b, s: (b, 0, 0)),    # shift [B,1,D]
                pl.BlockSpec((1, 1, D), lambda b, s: (b, 0, 0)),    # scale [B,1,D]
                pl.BlockSpec((1, TS, D), lambda b, s: (b, s, 0)),   # hidden
            ],
            out_specs=pl.BlockSpec((1, TS, D), lambda b, s: (b, s, 0)),
        ),
        compiler_params=pltpu.CompilerParams(
            dimension_semantics=("parallel", "parallel"),
            vmem_limit_bytes=vmem_limit),
        cost_estimate=cost,
    )(shift, scale, hidden_states)


def reference(hidden_states, emb, weight, bias):
    """Pure-JAX reference matching the PyTorch forward."""
    e = emb.astype(jnp.float32)
    se = e * jax.nn.sigmoid(e)
    proj = se @ weight.astype(jnp.float32) + bias.astype(jnp.float32)
    D = hidden_states.shape[-1]
    shift, scale = proj[:, :D], proj[:, D:]
    h = hidden_states.astype(jnp.float32)
    mean = h.mean(-1, keepdims=True)
    var = ((h - mean) ** 2).mean(-1, keepdims=True)
    h_norm = (h - mean) * lax.rsqrt(var + 1e-6)
    out = h_norm * (1 + scale[:, None, :]) + shift[:, None, :]
    return out.astype(hidden_states.dtype)


if __name__ == "__main__":
    B, S, D = 2, 8, 32  # batch, seq, embedding_dim (small test shape)
    # NOTE: real deployments should use D that is a multiple of 128 (e.g. 1152,
    # 3072) so output stores are lane-dense; this toy shape is correctness-only.

    key = jax.random.PRNGKey(0)
    k_h, k_e, k_w, k_b = jax.random.split(key, 4)

    hidden_states = jax.random.normal(k_h, (B, S, D), dtype=jnp.float32)
    emb = jax.random.normal(k_e, (B, D), dtype=jnp.float32)

    # nn.Linear(D, 2D, bias=True): PyTorch weight is [2D, D]; we store it
    # transposed as [D, 2D] so the kernel computes x @ W.
    bound = 1.0 / (D ** 0.5)
    weight = jax.random.uniform(k_w, (D, 2 * D), minval=-bound, maxval=bound,
                                dtype=jnp.float32)
    bias = jax.random.uniform(k_b, (2 * D,), minval=-bound, maxval=bound,
                              dtype=jnp.float32)

    out = ada_layer_norm_continuous(hidden_states, emb, weight, bias)
    out = jax.block_until_ready(out)

    ref = reference(hidden_states, emb, weight, bias)
    assert out.shape == (B, S, D)
    assert jnp.allclose(out, ref, atol=2e-5, rtol=2e-5), "mismatch vs reference"

    print("KERNEL_OK")
</pallas_src>

<mosaic_0001>
module attributes {stable_mosaic.version = 11 : i64} {
  func.func @silu_linear_kernel(%arg0: i32, %arg1: memref<2x32xf32, #tpu.memory_space<vmem>>, %arg2: memref<32x64xf32, #tpu.memory_space<vmem>>, %arg3: memref<1x64xf32, #tpu.memory_space<vmem>>, %arg4: memref<2x64xf32, #tpu.memory_space<vmem>>) attributes {dimension_semantics = [#tpu.dimension_semantics<parallel>], iteration_bounds = array<i64: 1>, scalar_prefetch = 0 : i64, scratch_operands = 0 : i64, tpu.core_type = #tpu.core_type<tc>, window_params = [{pipeline_mode = #tpu.pipeline_mode<synchronous>, transform_indices = @transform_0, window_bounds = array<i64: 2, 32>}, {transform_indices = @transform_1, window_bounds = array<i64: 32, 64>}, {transform_indices = @transform_2, window_bounds = array<i64: 1, 64>}, {transform_indices = @transform_3, window_bounds = array<i64: 2, 64>}]} {
    %c0 = arith.constant 0 : index
    %c0_0 = arith.constant 0 : index
    %0 = vector.load %arg1[%c0, %c0_0] : memref<2x32xf32, #tpu.memory_space<vmem>>, vector<2x32xf32>
    %1 = arith.negf %0 : vector<2x32xf32>
    %2 = math.exp %1 : vector<2x32xf32>
    %cst = arith.constant 1.000000e+00 : f32
    %3 = vector.broadcast %cst : f32 to vector<2x32xf32>
    %4 = arith.addf %3, %2 : vector<2x32xf32>
    %5 = arith.divf %3, %4 : vector<2x32xf32>
    %6 = arith.mulf %0, %5 : vector<2x32xf32>
    %c0_1 = arith.constant 0 : index
    %c0_2 = arith.constant 0 : index
    %7 = vector.load %arg2[%c0_1, %c0_2] : memref<32x64xf32, #tpu.memory_space<vmem>>, vector<32x64xf32>
    %cst_3 = arith.constant dense<0.000000e+00> : vector<2x64xf32>
    %8 = tpu.matmul %6, %7, %cst_3 {dimension_numbers = #tpu.dot_dimension_numbers<[1], [0], [0], [1], [0, 0, 1, 1], [], []>} : vector<2x32xf32>, vector<32x64xf32>, vector<2x64xf32> -> vector<2x64xf32>
    %c0_4 = arith.constant 0 : index
    %c0_5 = arith.constant 0 : index
    %9 = vector.load %arg3[%c0_4, %c0_5] : memref<1x64xf32, #tpu.memory_space<vmem>>, vector<1x64xf32>
    %10 = vector.broadcast %9 : vector<1x64xf32> to vector<2x64xf32>
    %11 = arith.addf %8, %10 : vector<2x64xf32>
    %c0_6 = arith.constant 0 : index
    %c0_7 = arith.constant 0 : index
    %12 = vector.load %arg4[%c0_6, %c0_7] : memref<2x64xf32, #tpu.memory_space<vmem>>, vector<2x64xf32>
    tpu.vector_store %arg4[%c0_6, %c0_7], %11 {strides = array<i32>} : memref<2x64xf32, #tpu.memory_space<vmem>>, vector<2x64xf32>,
    return
  }
  func.func @transform_0(%arg0: i32) -> (i32, i32) {
    %c0_i32 = arith.constant 0 : i32
    %c0_i32_0 = arith.constant 0 : i32
    %c0_i32_1 = arith.constant 0 : i32
    return %c0_i32, %c0_i32_0 : i32, i32
  }
  func.func @transform_1(%arg0: i32) -> (i32, i32) {
    %c0_i32 = arith.constant 0 : i32
    %c0_i32_0 = arith.constant 0 : i32
    return %c0_i32, %arg0 : i32, i32
  }
  func.func @transform_2(%arg0: i32) -> (i32, i32) {
    %c0_i32 = arith.constant 0 : i32
    %c0_i32_0 = arith.constant 0 : i32
    return %c0_i32, %arg0 : i32, i32
  }
  func.func @transform_3(%arg0: i32) -> (i32, i32) {
    %c0_i32 = arith.constant 0 : i32
    %c0_i32_0 = arith.constant 0 : i32
    return %c0_i32, %arg0 : i32, i32
  }
}

</mosaic_0001>

<bundles_post_ra>
// kernel: tpu_custom_call.1
= control target key start
LH: loop header
LB: loop body
LE: loop exit
PB: predicated region body
PF: predicated region fallthrough
CT: control target
= control target key end

     0   :  { %8 = vsyncpa [#allocation3], 0  ;;  %s245_s0 = inlined_call_operand.hbm [shape: f32[2,32], index: 0, kind: input, shape index: {}]   ;;  %s246_s1 = inlined_call_operand.hbm [shape: f32[32,64], index: 1, kind: input, shape index: {}]   ;;  %s247_s2 = inlined_call_operand.vmem [shape: f32[1,64], index: 2, kind: input, shape index: {}]   ;;  %s248_s3 = inlined_call_operand.hbm [shape: f32[2,64], index: 3, kind: output, shape index: {}]  }
   0x1   :  { %9 = vsyncpa [#allocation6], 0 }
   0x2   :  { %10 = vsyncpa [#allocation4], 0  ;;  %s16_s14 = sshll.u32 %s245_s0, 4  ;;  %s208_s15 = smov [#allocation2]   ;;  %s17_s14 = int_to_ptr.hbm [resolvable:$true] %s16_s14 }
   0x3   :  { %s18_s16 = sshll.u32 %s208_s15, 4  ;;  %s26_s19 = sshll.u32 %s246_s1, 4  ;;  %s19_s16 = int_to_ptr.vmem [resolvable:$true] %s18_s16  ;;  %s27_s19 = int_to_ptr.hbm [resolvable:$true] %s26_s19 }
   0x4   :  { %21 = dma.hbm_to_vmem [thread:$0]  %s17_s14, 32, %s19_s16, [#allocation3]  }
   0x5   :  { %s209_s20 = smov [#allocation5]   ;;  %s210_s22 = smov 128  }
   0x6   :  { %s28_s21 = sshll.u32 %s209_s20, 4  ;;  %s211_s23 = smov 8   ;;  %s29_s21 = int_to_ptr.vmem [resolvable:$true] %s28_s21 }
   0x7   :  { %34 = dma.hbm_to_vmem [thread:$0]  %s27_s19, 512, %s29_s21, [#allocation6], %s210_s22, %s210_s22, %s211_s23  }
   0x8   :  { %202 = dma.done.wait [#allocation3], 32  }
   0x9   :  { %203 = vsyncadd [#allocation3], 4294967264 }
   0xa   :  { %204 = dma.done.wait [#allocation6], 512  }
   0xb   :  { %205 = vsyncadd [#allocation6], 4294966784  ;;  %v69_v0 = vld [vmem:[#allocation5 + $0x18] sm:$0xff]  ;;  %v68_v1 = vld [vmem:[#allocation5 + $0x10] sm:$0xff]  ;;  %vm74_vm4 = vcmask 261120   ;;  %s212_s24 = smov [#allocation7]  }
   0xc   :  { %90 = vmatpush.msra.mxu0 %v69_v0  ;;  %v45_v2 = vld [vmem:[#allocation2] sm:$0x3]  ;;  %v67_v3 = vld [vmem:[#allocation5 + $0x8] sm:$0xff]  ;;  %v66_v5 = vld [vmem:[#allocation5] sm:$0xff]  ;;  %s105_s25 = sshll.u32 %s212_s24, 4  ;;  %s107_s28 = sshll.u32 %s248_s3, 4  ;;  %s106_s25 = int_to_ptr.vmem [resolvable:$true] %s105_s25  ;;  %s108_s28 = int_to_ptr.hbm [resolvable:$true] %s107_s28 }
   0xd   :  { %v118_v4 = vmul.f32 -1.442695, %v45_v2  ;;  %v125_v19 = vld [vmem:[%s247_s2] ss:$0 sm:$0xff]  ;;  %vm98_vm5 = vcmask 517120  }
   0xe   :  { %91 = vmatpush.msra.mxu0 %v68_v1 }
   0xf   :  { %126 = vpow2.f32 %v118_v4 }
  0x10   :  { %92 = vmatpush.msra.mxu0 %v67_v3 }
  0x12   :  { %93 = vmatpush.msra.mxu0 %v66_v5 }
  0x15   :  { %v127_v6 = vpop.eup %126 }
  0x16   :  { %v49_v7 = vadd.f32 1.0, %v127_v6 }
  0x18   :  { %128 = vrcp.f32 %v49_v7  ;;  %v61_v10 = vand.u32 2147483648, %v49_v7  ;;  %vm55_vm0 = vweird.f32 %v49_v7  ;;  %v59_v12 = vand.u32 2147483647, %v49_v7 }
  0x1a   :  { %v62_v14 = vor.u32 1.1754944e-38, %v61_v10  ;;  %vm60_vm3 = vcmp.eq.f32.partialorder %v59_v12, 8.507059e+37 }
  0x1e   :  { %v129_v8 = vpop.eup %128 }
  0x1f   :  { %v51_v9 = vmul.f32 %v129_v8, %v49_v7  ;;  %vm56_vm1 = vweird.f32 %v129_v8 }
  0x20   :  { %vm57_vm2 = vmor %vm55_vm0, %vm56_vm1 }
  0x21   :  { %v52_v11 = vsub.f32 1.0, %v51_v9 }
  0x23   :  { %v53_v13 = vmul.f32 %v129_v8, %v52_v11 }
  0x25   :  { %v54_v15 = vadd.f32 %v129_v8, %v53_v13 }
  0x27   :  { %v58_v16 = vsel %vm57_vm2, %v129_v8, %v54_v15 }
  0x28   :  { %v63_v17 = vsel %vm60_vm3, %v62_v14, %v58_v16 }
  0x29   :  { %v65_v18 = vmul.f32 %v63_v17, %v45_v2 }
  0x2b   :  { %119 = vmatmul.msk.f32.vlgmr.msra.gmra.mxu0 %vm74_vm4, %v65_v18 }
  0xa8   :  { %v95_v20 = vpop.f32.mrf.mxu0 }
  0xa9   :  { %v96_v21 = vadd.f32 %v125_v19, %v95_v20 }
  0xab   :  { %99 = vst.msk [vmem:[#allocation7] sm:$0x3] %vm98_vm5, %v96_v21 }
  0xac   :  { %110 = dma.vmem_to_hbm [thread:$0]  %s106_s25, 32, %s108_s28, [#allocation4]  }
  0xad   :  { %206 = dma.done.wait [#allocation4], 32  }
  0xae   :  { %207 = vsyncadd [#allocation4], 4294967264 }
  0xaf   :  { %115 = vsyncpa [#allocation3], 1 }
  0xb0   :  { %116 = vsyncpa [#allocation6], 1 }
  0xb1   :  { %117 = vsyncpa [#allocation4], 1 }

</bundles_post_ra>
